<compile_context>
chip_gen: v5e
topology: v5e:2x2
jax: 0.10.0
libtpu: 0.0.40
codegen_flags: <defaults>
</compile_context>

<pallas_src>
import functools

import jax
import jax.numpy as jnp
from jax.experimental import pallas as pl
from jax.experimental.pallas import tpu as pltpu

_LANE = 128
_SUBLANE = 8


def _round_up(x, m):
    return (x + m - 1) // m * m


def _ffnn_kernel(x_ref, w1_ref, b1_ref, w2_ref, b2_ref, g_ref, beta_ref,
                 o_ref, acc_ref, *, inv_e):
    k = pl.program_id(1)

    @pl.when(k == 0)
    def _():
        acc_ref[...] = jnp.zeros_like(acc_ref)

    # MXU matmuls on native-dtype operands, f32 accumulation.
    x = x_ref[...]
    h = jnp.dot(x, w1_ref[...], preferred_element_type=jnp.float32)
    h = jnp.maximum(h + b1_ref[...].astype(jnp.float32), 0.0)
    acc_ref[...] += jnp.dot(h.astype(x.dtype), w2_ref[...],
                            preferred_element_type=jnp.float32)

    @pl.when(k == pl.num_programs(1) - 1)
    def _():
        # residual + LayerNorm (f32).  Pad lanes of r are exactly zero, so sums over
        # the padded lane width equal sums over the true E columns; divide by true E.
        r = x.astype(jnp.float32) + acc_ref[...] + b2_ref[...].astype(jnp.float32)
        s = jnp.sum(r, axis=-1, keepdims=True)
        sq = jnp.sum(r * r, axis=-1, keepdims=True)
        mean = s * inv_e
        var = sq * inv_e - mean * mean
        normed = (r - mean) * jax.lax.rsqrt(var + 1e-5)
        out = (normed * g_ref[...].astype(jnp.float32)
               + beta_ref[...].astype(jnp.float32))
        o_ref[...] = out.astype(o_ref.dtype)


@functools.partial(jax.jit, static_argnames=("tm", "th"))
def ffnn_pallas(x, w1, b1, w2, b2, gamma, beta, *, tm=256, th=512):
    """x: (..., E); w1: (E, H); w2: (H, E).  Returns same shape/dtype as x."""
    orig_shape = x.shape
    E = orig_shape[-1]
    H = w1.shape[1]
    x2d = x.reshape(-1, E)
    M = x2d.shape[0]

    # Row tile: big for MXU utilization, clamped/rounded (mult of 8) for small inputs.
    tm_eff = min(_round_up(tm, _SUBLANE), _round_up(M, _SUBLANE))
    M_pad = _round_up(M, tm_eff)

    # Lane-dense feature dims (multiples of 128); hidden dim padded to the H tile.
    E_pad = _round_up(E, _LANE)
    th_eff = min(_round_up(th, _LANE), _round_up(H, _LANE))
    H_pad = _round_up(H, th_eff)

    x_p = jnp.pad(x2d, ((0, M_pad - M), (0, E_pad - E)))
    w1_p = jnp.pad(w1, ((0, E_pad - E), (0, H_pad - H)))
    b1_p = jnp.pad(b1, (0, H_pad - H)).reshape(1, H_pad)
    w2_p = jnp.pad(w2, ((0, H_pad - H), (0, E_pad - E)))
    b2_p = jnp.pad(b2, (0, E_pad - E)).reshape(1, E_pad)
    g_p = jnp.pad(gamma, (0, E_pad - E)).reshape(1, E_pad)
    beta_p = jnp.pad(beta, (0, E_pad - E)).reshape(1, E_pad)

    grid = (M_pad // tm_eff, H_pad // th_eff)

    # Explicit VMEM budget: double-buffered x/out/weight tiles + f32 accumulator,
    # 2x margin, clamped so the limit is valid on v5e/v6e/v7x.
    itemsize = jnp.dtype(x.dtype).itemsize
    w_itemsize = jnp.dtype(w1.dtype).itemsize
    est = (2 * 2 * tm_eff * E_pad * itemsize                      # x + out, 2-buffered
           + 2 * 2 * E_pad * th_eff * w_itemsize                  # W1 + W2, 2-buffered
           + tm_eff * E_pad * 4                                   # f32 accumulator
           + 4 * (th_eff + 3 * E_pad) * 4)                        # biases / affine
    vmem_limit = int(min(64 * 1024 * 1024, max(32 * 1024 * 1024, 2 * est)))

    kernel = functools.partial(_ffnn_kernel, inv_e=1.0 / E)

    out = pl.pallas_call(
        kernel,
        out_shape=jax.ShapeDtypeStruct((M_pad, E_pad), x.dtype),
        grid_spec=pltpu.PrefetchScalarGridSpec(
            num_scalar_prefetch=0,
            grid=grid,
            in_specs=[
                pl.BlockSpec((tm_eff, E_pad), lambda i, k: (i, 0)),   # x rows
                pl.BlockSpec((E_pad, th_eff), lambda i, k: (0, k)),   # W1 column tile
                pl.BlockSpec((1, th_eff), lambda i, k: (0, k)),       # b1 tile
                pl.BlockSpec((th_eff, E_pad), lambda i, k: (k, 0)),   # W2 row tile
                pl.BlockSpec((1, E_pad), lambda i, k: (0, 0)),        # b2
                pl.BlockSpec((1, E_pad), lambda i, k: (0, 0)),        # LN gamma
                pl.BlockSpec((1, E_pad), lambda i, k: (0, 0)),        # LN beta
            ],
            out_specs=pl.BlockSpec((tm_eff, E_pad), lambda i, k: (i, 0)),
            scratch_shapes=[pltpu.VMEM((tm_eff, E_pad), jnp.float32)],
        ),
        compiler_params=pltpu.CompilerParams(
            dimension_semantics=("parallel", "arbitrary"),
            vmem_limit_bytes=vmem_limit,
        ),
    )(x_p, w1_p, b1_p, w2_p, b2_p, g_p, beta_p)

    return out[:M, :E].reshape(orig_shape)


def ffnn_reference(x, w1, b1, w2, b2, gamma, beta):
    """Pure-JAX reference mirroring the PyTorch forward."""
    h = jnp.maximum(x @ w1 + b1, 0.0)
    y = h @ w2 + b2
    r = x + y
    mean = jnp.mean(r, axis=-1, keepdims=True)
    var = jnp.mean((r - mean) ** 2, axis=-1, keepdims=True)
    return (r - mean) / jnp.sqrt(var + 1e-5) * gamma + beta


def _make_params(key, E, H):
    kw1, kb1, kw2, kb2 = jax.random.split(key, 4)
    bound1 = 1.0 / (E ** 0.5)
    w1 = jax.random.uniform(kw1, (E, H), jnp.float32, -bound1, bound1)
    b1 = jax.random.uniform(kb1, (H,), jnp.float32, -bound1, bound1)
    bound2 = 1.0 / (H ** 0.5)
    w2 = jax.random.uniform(kw2, (H, E), jnp.float32, -bound2, bound2)
    b2 = jax.random.uniform(kb2, (E,), jnp.float32, -bound2, bound2)
    gamma = jnp.ones((E,), jnp.float32)
    beta = jnp.zeros((E,), jnp.float32)
    return w1, b1, w2, b2, gamma, beta


if __name__ == "__main__":
    key = jax.random.PRNGKey(0)
    k1, k2, k3, k4 = jax.random.split(key, 4)

    # Test 1: shapes consistent with the module's forward:
    # embeddings (batch=2, seq=8, embedding_dim=32), hidden_dim=64.
    batch, seq, E, H = 2, 8, 32, 64
    x = jax.random.normal(k1, (batch, seq, E), dtype=jnp.float32)
    params = _make_params(k2, E, H)
    out = jax.block_until_ready(ffnn_pallas(x, *params))
    ref = ffnn_reference(x, *params)
    assert out.shape == x.shape and out.dtype == x.dtype
    assert jnp.allclose(out, ref, atol=1e-4, rtol=1e-4), "mismatch vs reference (test 1)"

    # Test 2: non-tile-multiple rows and multiple hidden-dim tiles
    # (exercises padding, the k-accumulator path, and lane padding).
    batch, seq, E, H = 3, 10, 96, 160
    x = jax.random.normal(k3, (batch, seq, E), dtype=jnp.float32)
    params = _make_params(k4, E, H)
    out = jax.block_until_ready(ffnn_pallas(x, *params, tm=16, th=128))
    ref = ffnn_reference(x, *params)
    assert out.shape == x.shape and out.dtype == x.dtype
    assert jnp.allclose(out, ref, atol=1e-4, rtol=1e-4), "mismatch vs reference (test 2)"

    print("KERNEL_OK")
</pallas_src>

<mosaic_0001>
module attributes {stable_mosaic.version = 11 : i64} {
  func.func @_ffnn_kernel(%arg0: i32, %arg1: i32, %arg2: memref<16x128xf32, #tpu.memory_space<vmem>>, %arg3: memref<128x128xf32, #tpu.memory_space<vmem>>, %arg4: memref<1x128xf32, #tpu.memory_space<vmem>>, %arg5: memref<128x128xf32, #tpu.memory_space<vmem>>, %arg6: memref<1x128xf32, #tpu.memory_space<vmem>>, %arg7: memref<1x128xf32, #tpu.memory_space<vmem>>, %arg8: memref<1x128xf32, #tpu.memory_space<vmem>>, %arg9: memref<16x128xf32, #tpu.memory_space<vmem>>, %arg10: memref<16x128xf32, #tpu.memory_space<vmem>>) attributes {dimension_semantics = [#tpu.dimension_semantics<parallel>, #tpu.dimension_semantics<arbitrary>], iteration_bounds = array<i64: 1, 1>, scalar_prefetch = 0 : i64, scratch_operands = 1 : i64, tpu.core_type = #tpu.core_type<tc>, window_params = [{transform_indices = @transform_0, window_bounds = array<i64: 16, 128>}, {transform_indices = @transform_1, window_bounds = array<i64: 128, 128>}, {transform_indices = @transform_2, window_bounds = array<i64: 1, 128>}, {transform_indices = @transform_3, window_bounds = array<i64: 128, 128>}, {pipeline_mode = #tpu.pipeline_mode<synchronous>, transform_indices = @transform_4, window_bounds = array<i64: 1, 128>}, {pipeline_mode = #tpu.pipeline_mode<synchronous>, transform_indices = @transform_5, window_bounds = array<i64: 1, 128>}, {pipeline_mode = #tpu.pipeline_mode<synchronous>, transform_indices = @transform_6, window_bounds = array<i64: 1, 128>}, {transform_indices = @transform_7, window_bounds = array<i64: 16, 128>}]} {
    %c0_i32 = arith.constant 0 : i32
    %0 = arith.cmpi eq, %arg1, %c0_i32 : i32
    %1 = arith.extui %0 : i1 to i32
    %c0_i32_0 = arith.constant 0 : i32
    %2 = arith.cmpi ne, %1, %c0_i32_0 : i32
    scf.if %2 {
      %cst_16 = arith.constant 0.000000e+00 : f32
      %19 = vector.broadcast %cst_16 : f32 to vector<16x128xf32>
      %c0_17 = arith.constant 0 : index
      %c0_18 = arith.constant 0 : index
      %20 = vector.load %arg10[%c0_17, %c0_18] : memref<16x128xf32, #tpu.memory_space<vmem>>, vector<16x128xf32>
      tpu.vector_store %arg10[%c0_17, %c0_18], %19 {strides = array<i32>} : memref<16x128xf32, #tpu.memory_space<vmem>>, vector<16x128xf32>,
    } else {
    }
    %c0 = arith.constant 0 : index
    %c0_1 = arith.constant 0 : index
    %3 = vector.load %arg2[%c0, %c0_1] : memref<16x128xf32, #tpu.memory_space<vmem>>, vector<16x128xf32>
    %c0_2 = arith.constant 0 : index
    %c0_3 = arith.constant 0 : index
    %4 = vector.load %arg3[%c0_2, %c0_3] : memref<128x128xf32, #tpu.memory_space<vmem>>, vector<128x128xf32>
    %cst = arith.constant dense<0.000000e+00> : vector<16x128xf32>
    %5 = tpu.matmul %3, %4, %cst {dimension_numbers = #tpu.dot_dimension_numbers<[1], [0], [0], [1], [0, 0, 1, 1], [], []>} : vector<16x128xf32>, vector<128x128xf32>, vector<16x128xf32> -> vector<16x128xf32>
    %c0_4 = arith.constant 0 : index
    %c0_5 = arith.constant 0 : index
    %6 = vector.load %arg4[%c0_4, %c0_5] : memref<1x128xf32, #tpu.memory_space<vmem>>, vector<1x128xf32>
    %7 = vector.broadcast %6 : vector<1x128xf32> to vector<16x128xf32>
    %8 = arith.addf %5, %7 : vector<16x128xf32>
    %cst_6 = arith.constant 0.000000e+00 : f32
    %9 = vector.broadcast %cst_6 : f32 to vector<16x128xf32>
    %10 = arith.maximumf %8, %9 : vector<16x128xf32>
    %c0_7 = arith.constant 0 : index
    %c0_8 = arith.constant 0 : index
    %11 = vector.load %arg10[%c0_7, %c0_8] : memref<16x128xf32, #tpu.memory_space<vmem>>, vector<16x128xf32>
    %c0_9 = arith.constant 0 : index
    %c0_10 = arith.constant 0 : index
    %12 = vector.load %arg5[%c0_9, %c0_10] : memref<128x128xf32, #tpu.memory_space<vmem>>, vector<128x128xf32>
    %cst_11 = arith.constant dense<0.000000e+00> : vector<16x128xf32>
    %13 = tpu.matmul %10, %12, %cst_11 {dimension_numbers = #tpu.dot_dimension_numbers<[1], [0], [0], [1], [0, 0, 1, 1], [], []>} : vector<16x128xf32>, vector<128x128xf32>, vector<16x128xf32> -> vector<16x128xf32>
    %14 = arith.addf %11, %13 : vector<16x128xf32>
    %c0_12 = arith.constant 0 : index
    %c0_13 = arith.constant 0 : index
    %15 = vector.load %arg10[%c0_12, %c0_13] : memref<16x128xf32, #tpu.memory_space<vmem>>, vector<16x128xf32>
    tpu.vector_store %arg10[%c0_12, %c0_13], %14 {strides = array<i32>} : memref<16x128xf32, #tpu.memory_space<vmem>>, vector<16x128xf32>,
    %c0_i32_14 = arith.constant 0 : i32
    %16 = arith.cmpi eq, %arg1, %c0_i32_14 : i32
    %17 = arith.extui %16 : i1 to i32
    %c0_i32_15 = arith.constant 0 : i32
    %18 = arith.cmpi ne, %17, %c0_i32_15 : i32
    scf.if %18 {
      %c0_16 = arith.constant 0 : index
      %c0_17 = arith.constant 0 : index
      %19 = vector.load %arg10[%c0_16, %c0_17] : memref<16x128xf32, #tpu.memory_space<vmem>>, vector<16x128xf32>
      %20 = arith.addf %3, %19 : vector<16x128xf32>
      %c0_18 = arith.constant 0 : index
      %c0_19 = arith.constant 0 : index
      %21 = vector.load %arg6[%c0_18, %c0_19] : memref<1x128xf32, #tpu.memory_space<vmem>>, vector<1x128xf32>
      %22 = vector.broadcast %21 : vector<1x128xf32> to vector<16x128xf32>
      %23 = arith.addf %20, %22 : vector<16x128xf32>
      %cst_20 = arith.constant dense<0.000000e+00> : vector<16xf32>
      %24 = vector.multi_reduction <add>, %23, %cst_20 [1] : vector<16x128xf32> to vector<16xf32>
      %25 = vector.shape_cast %24 : vector<16xf32> to vector<16x1xf32>
      %26 = arith.mulf %23, %23 : vector<16x128xf32>
      %cst_21 = arith.constant dense<0.000000e+00> : vector<16xf32>
      %27 = vector.multi_reduction <add>, %26, %cst_21 [1] : vector<16x128xf32> to vector<16xf32>
      %28 = vector.shape_cast %27 : vector<16xf32> to vector<16x1xf32>
      %cst_22 = arith.constant 3.125000e-02 : f32
      %29 = vector.broadcast %cst_22 : f32 to vector<16x1xf32>
      %30 = arith.mulf %25, %29 : vector<16x1xf32>
      %cst_23 = arith.constant 3.125000e-02 : f32
      %31 = vector.broadcast %cst_23 : f32 to vector<16x1xf32>
      %32 = arith.mulf %28, %31 : vector<16x1xf32>
      %33 = arith.mulf %30, %30 : vector<16x1xf32>
      %34 = arith.subf %32, %33 : vector<16x1xf32>
      %35 = vector.broadcast %30 : vector<16x1xf32> to vector<16x128xf32>
      %36 = arith.subf %23, %35 : vector<16x128xf32>
      %cst_24 = arith.constant 9.99999974E-6 : f32
      %37 = vector.broadcast %cst_24 : f32 to vector<16x1xf32>
      %38 = arith.addf %34, %37 : vector<16x1xf32>
      %39 = math.rsqrt %38 : vector<16x1xf32>
      %40 = vector.broadcast %39 : vector<16x1xf32> to vector<16x128xf32>
      %41 = arith.mulf %36, %40 : vector<16x128xf32>
      %c0_25 = arith.constant 0 : index
      %c0_26 = arith.constant 0 : index
      %42 = vector.load %arg7[%c0_25, %c0_26] : memref<1x128xf32, #tpu.memory_space<vmem>>, vector<1x128xf32>
      %43 = vector.broadcast %42 : vector<1x128xf32> to vector<16x128xf32>
      %44 = arith.mulf %41, %43 : vector<16x128xf32>
      %c0_27 = arith.constant 0 : index
      %c0_28 = arith.constant 0 : index
      %45 = vector.load %arg8[%c0_27, %c0_28] : memref<1x128xf32, #tpu.memory_space<vmem>>, vector<1x128xf32>
      %46 = vector.broadcast %45 : vector<1x128xf32> to vector<16x128xf32>
      %47 = arith.addf %44, %46 : vector<16x128xf32>
      %c0_29 = arith.constant 0 : index
      %c0_30 = arith.constant 0 : index
      %48 = vector.load %arg9[%c0_29, %c0_30] : memref<16x128xf32, #tpu.memory_space<vmem>>, vector<16x128xf32>
      tpu.vector_store %arg9[%c0_29, %c0_30], %47 {strides = array<i32>} : memref<16x128xf32, #tpu.memory_space<vmem>>, vector<16x128xf32>,
    } else {
    }
    return
  }
  func.func @transform_0(%arg0: i32, %arg1: i32) -> (i32, i32) {
    %c0_i32 = arith.constant 0 : i32
    %c0_i32_0 = arith.constant 0 : i32
    return %arg0, %c0_i32 : i32, i32
  }
  func.func @transform_1(%arg0: i32, %arg1: i32) -> (i32, i32) {
    %c0_i32 = arith.constant 0 : i32
    %c0_i32_0 = arith.constant 0 : i32
    return %c0_i32, %arg1 : i32, i32
  }
  func.func @transform_2(%arg0: i32, %arg1: i32) -> (i32, i32) {
    %c0_i32 = arith.constant 0 : i32
    %c0_i32_0 = arith.constant 0 : i32
    return %c0_i32, %arg1 : i32, i32
  }
  func.func @transform_3(%arg0: i32, %arg1: i32) -> (i32, i32) {
    %c0_i32 = arith.constant 0 : i32
    %c0_i32_0 = arith.constant 0 : i32
    return %arg1, %c0_i32 : i32, i32
  }
  func.func @transform_4(%arg0: i32, %arg1: i32) -> (i32, i32) {
    %c0_i32 = arith.constant 0 : i32
    %c0_i32_0 = arith.constant 0 : i32
    %c0_i32_1 = arith.constant 0 : i32
    return %c0_i32, %c0_i32_0 : i32, i32
  }
  func.func @transform_5(%arg0: i32, %arg1: i32) -> (i32, i32) {
    %c0_i32 = arith.constant 0 : i32
    %c0_i32_0 = arith.constant 0 : i32
    %c0_i32_1 = arith.constant 0 : i32
    return %c0_i32, %c0_i32_0 : i32, i32
  }
  func.func @transform_6(%arg0: i32, %arg1: i32) -> (i32, i32) {
    %c0_i32 = arith.constant 0 : i32
    %c0_i32_0 = arith.constant 0 : i32
    %c0_i32_1 = arith.constant 0 : i32
    return %c0_i32, %c0_i32_0 : i32, i32
  }
  func.func @transform_7(%arg0: i32, %arg1: i32) -> (i32, i32) {
    %c0_i32 = arith.constant 0 : i32
    %c0_i32_0 = arith.constant 0 : i32
    return %arg0, %c0_i32 : i32, i32
  }
}

</mosaic_0001>

<bundles_post_ra>
// kernel: ffnn_pallas.1
= control target key start
LH: loop header
LB: loop body
LE: loop exit
PB: predicated region body
PF: predicated region fallthrough
CT: control target
= control target key end

     0   :  { %s399_s1 = inlined_call_operand.vmem [shape: f32[128,128], index: 1, kind: input, shape index: {}]   ;;  %s400_s3 = inlined_call_operand.vmem [shape: f32[128,128], index: 3, kind: input, shape index: {}]   ;;  %s401_s2 = inlined_call_operand.vmem [shape: f32[1,128], index: 2, kind: input, shape index: {}]   ;;  %s402_s0 = inlined_call_operand.vmem [shape: f32[16,128], index: 0, kind: input, shape index: {}]   ;;  %s403_s4 = inlined_call_operand.vmem [shape: f32[1,128], index: 4, kind: input, shape index: {}]   ;;  %s404_s5 = inlined_call_operand.vmem [shape: f32[1,128], index: 5, kind: input, shape index: {}]   ;;  %s405_s6 = inlined_call_operand.vmem [shape: f32[1,128], index: 6, kind: input, shape index: {}]   ;;  %s406_s7 = inlined_call_operand.vmem [shape: f32[16,128], index: 7, kind: output, shape index: {}]  }
   0x1   :  { %v49_v0 = vld [vmem:[%s399_s1 + $0x78] sm:$0xff]  ;;  %v48_v1 = vld [vmem:[%s399_s1 + $0x70] sm:$0xff]  ;;  %v47_v2 = vld [vmem:[%s399_s1 + $0x68] sm:$0xff] }
   0x2   :  { %54 = vmatpush.msra.mxu0 %v49_v0  ;;  %199 = vmatpush.msra.mxu2 %v49_v0  ;;  %v46_v3 = vld [vmem:[%s399_s1 + $0x60] sm:$0xff]  ;;  %v45_v4 = vld [vmem:[%s399_s1 + $0x58] sm:$0xff]  ;;  %v95_v6 = vld [vmem:[%s400_s3 + $0x70] sm:$0xff] }
   0x3   :  { %v96_v5 = vld [vmem:[%s400_s3 + $0x78] sm:$0xff]  ;;  %v44_v7 = vld [vmem:[%s399_s1 + $0x50] sm:$0xff]  ;;  %v94_v8 = vld [vmem:[%s400_s3 + $0x68] sm:$0xff] }
   0x4   :  { %55 = vmatpush.msra.mxu0 %v48_v1  ;;  %200 = vmatpush.msra.mxu2 %v48_v1  ;;  %v43_v9 = vld [vmem:[%s399_s1 + $0x48] sm:$0xff]  ;;  %v93_v10 = vld [vmem:[%s400_s3 + $0x60] sm:$0xff]  ;;  %v92_v12 = vld [vmem:[%s400_s3 + $0x58] sm:$0xff] }
   0x5   :  { %97 = vmatpush.msra.mxu1 %v96_v5  ;;  %215 = vmatpush.msra.mxu3 %v96_v5  ;;  %v42_v11 = vld [vmem:[%s399_s1 + $0x40] sm:$0xff]  ;;  %v41_v13 = vld [vmem:[%s399_s1 + $0x38] sm:$0xff]  ;;  %v91_v14 = vld [vmem:[%s400_s3 + $0x50] sm:$0xff] }
   0x6   :  { %56 = vmatpush.msra.mxu0 %v47_v2  ;;  %201 = vmatpush.msra.mxu2 %v47_v2  ;;  %v40_v15 = vld [vmem:[%s399_s1 + $0x30] sm:$0xff]  ;;  %v90_v16 = vld [vmem:[%s400_s3 + $0x48] sm:$0xff]  ;;  %v89_v18 = vld [vmem:[%s400_s3 + $0x40] sm:$0xff] }
   0x7   :  { %98 = vmatpush.msra.mxu1 %v95_v6  ;;  %216 = vmatpush.msra.mxu3 %v95_v6  ;;  %v39_v17 = vld [vmem:[%s399_s1 + $0x28] sm:$0xff]  ;;  %v38_v19 = vld [vmem:[%s399_s1 + $0x20] sm:$0xff]  ;;  %v88_v20 = vld [vmem:[%s400_s3 + $0x38] sm:$0xff] }
   0x8   :  { %57 = vmatpush.msra.mxu0 %v46_v3  ;;  %202 = vmatpush.msra.mxu2 %v46_v3  ;;  %v37_v21 = vld [vmem:[%s399_s1 + $0x18] sm:$0xff]  ;;  %v87_v22 = vld [vmem:[%s400_s3 + $0x30] sm:$0xff]  ;;  %v86_v24 = vld [vmem:[%s400_s3 + $0x28] sm:$0xff] }
   0x9   :  { %99 = vmatpush.msra.mxu1 %v94_v8  ;;  %217 = vmatpush.msra.mxu3 %v94_v8  ;;  %v36_v23 = vld [vmem:[%s399_s1 + $0x10] sm:$0xff]  ;;  %v35_v25 = vld [vmem:[%s399_s1 + $0x8] sm:$0xff]  ;;  %v85_v26 = vld [vmem:[%s400_s3 + $0x20] sm:$0xff] }
   0xa   :  { %58 = vmatpush.msra.mxu0 %v45_v4  ;;  %203 = vmatpush.msra.mxu2 %v45_v4  ;;  %v34_v27 = vld [vmem:[%s399_s1] sm:$0xff]  ;;  %v33_v29 = vld [vmem:[%s402_s0 + $0x8] sm:$0xff]  ;;  %v84_v30 = vld [vmem:[%s400_s3 + $0x18] sm:$0xff] }
   0xb   :  { %100 = vmatpush.msra.mxu1 %v93_v10  ;;  %218 = vmatpush.msra.mxu3 %v93_v10  ;;  %v32_v28 = vld [vmem:[%s402_s0] sm:$0xff]  ;;  %v83_v31 = vld [vmem:[%s400_s3 + $0x10] sm:$0xff]  ;;  %v82_v32 = vld [vmem:[%s400_s3 + $0x8] sm:$0xff] }
   0xc   :  { %59 = vmatpush.msra.mxu0 %v44_v7  ;;  %204 = vmatpush.msra.mxu2 %v44_v7  ;;  %v81_v33 = vld [vmem:[%s400_s3] sm:$0xff] }
   0xd   :  { %101 = vmatpush.msra.mxu1 %v92_v12  ;;  %219 = vmatpush.msra.mxu3 %v92_v12  ;;  %v231_v34 = vld [vmem:[%s401_s2] ss:$0 sm:$0xff] }
   0xe   :  { %60 = vmatpush.msra.mxu0 %v43_v9  ;;  %205 = vmatpush.msra.mxu2 %v43_v9  ;;  %v232_v41 = vld [vmem:[%s403_s4] ss:$0 sm:$0xff] }
   0xf   :  { %102 = vmatpush.msra.mxu1 %v91_v14  ;;  %220 = vmatpush.msra.mxu3 %v91_v14  ;;  %v233_v7 = vld [vmem:[%s404_s5] ss:$0 sm:$0xff] }
  0x10   :  { %61 = vmatpush.msra.mxu0 %v42_v11  ;;  %206 = vmatpush.msra.mxu2 %v42_v11  ;;  %v234_v10 = vld [vmem:[%s405_s6] ss:$0 sm:$0xff] }
  0x11   :  { %103 = vmatpush.msra.mxu1 %v90_v16  ;;  %221 = vmatpush.msra.mxu3 %v90_v16 }
  0x12   :  { %62 = vmatpush.msra.mxu0 %v41_v13  ;;  %207 = vmatpush.msra.mxu2 %v41_v13 }
  0x13   :  { %104 = vmatpush.msra.mxu1 %v89_v18  ;;  %222 = vmatpush.msra.mxu3 %v89_v18 }
  0x14   :  { %63 = vmatpush.msra.mxu0 %v40_v15  ;;  %208 = vmatpush.msra.mxu2 %v40_v15 }
  0x15   :  { %105 = vmatpush.msra.mxu1 %v88_v20  ;;  %223 = vmatpush.msra.mxu3 %v88_v20 }
  0x16   :  { %64 = vmatpush.msra.mxu0 %v39_v17  ;;  %209 = vmatpush.msra.mxu2 %v39_v17 }
  0x17   :  { %106 = vmatpush.msra.mxu1 %v87_v22  ;;  %224 = vmatpush.msra.mxu3 %v87_v22 }
  0x18   :  { %65 = vmatpush.msra.mxu0 %v38_v19  ;;  %210 = vmatpush.msra.mxu2 %v38_v19 }
  0x19   :  { %107 = vmatpush.msra.mxu1 %v86_v24  ;;  %225 = vmatpush.msra.mxu3 %v86_v24 }
  0x1a   :  { %66 = vmatpush.msra.mxu0 %v37_v21  ;;  %211 = vmatpush.msra.mxu2 %v37_v21 }
  0x1b   :  { %108 = vmatpush.msra.mxu1 %v85_v26  ;;  %226 = vmatpush.msra.mxu3 %v85_v26 }
  0x1c   :  { %67 = vmatpush.msra.mxu0 %v36_v23  ;;  %212 = vmatpush.msra.mxu2 %v36_v23 }
  0x1d   :  { %109 = vmatpush.msra.mxu1 %v84_v30  ;;  %227 = vmatpush.msra.mxu3 %v84_v30 }
  0x1e   :  { %68 = vmatpush.msra.mxu0 %v35_v25  ;;  %213 = vmatpush.msra.mxu2 %v35_v25 }
  0x1f   :  { %110 = vmatpush.msra.mxu1 %v83_v31  ;;  %228 = vmatpush.msra.mxu3 %v83_v31 }
  0x20   :  { %69 = vmatpush.msra.mxu0 %v34_v27  ;;  %214 = vmatpush.msra.mxu2 %v34_v27 }
  0x21   :  { %70 = vmatmul.f32.vlgmr.msra.gmra.mxu0 %v32_v28  ;;  %73 = vmatmul.f32.vlgmr.msra.gmra.mxu2 %v33_v29 }
  0x22   :  { %111 = vmatpush.msra.mxu1 %v82_v32  ;;  %229 = vmatpush.msra.mxu3 %v82_v32 }
  0x24   :  { %112 = vmatpush.msra.mxu1 %v81_v33  ;;  %230 = vmatpush.msra.mxu3 %v81_v33 }
  0x9e   :  { %v71_v35 = vpop.f32.mrf.mxu0 }
  0x9f   :  { %v72_v36 = vadd.f32 %v231_v34, %v71_v35 }
  0xa1   :  { %v77_v37 = vmax.f32 %v72_v36, 0.0 }
  0xa3   :  { %113 = vmatmul.f32.vlgmr.msra.gmra.mxu1 %v77_v37 }
  0xa4   :  { %v74_v38 = vpop.f32.mrf.mxu2 }
  0xa5   :  { %v75_v39 = vadd.f32 %v231_v34, %v74_v38 }
  0xa7   :  { %v78_v40 = vmax.f32 %v75_v39, 0.0 }
  0xa9   :  { %116 = vmatmul.f32.vlgmr.msra.gmra.mxu3 %v78_v40 }
 0x120   :  { %v114_v42 = vpop.f32.mrf.mxu1 }
 0x121   :  { %v129_v43 = vadd.f32 %v114_v42, %v32_v28 }
 0x123   :  { %v135_v44 = vadd.f32 %v232_v41, %v129_v43 }
 0x125   :  { %137 = vadd.xlane.f32.xlu0 %v135_v44  ;;  %v141_v45 = vmul.f32 %v135_v44, %v135_v44 }
 0x127   :  { %143 = vadd.xlane.f32.xlu1 %v141_v45 }
 0x12c   :  { %v117_v46 = vpop.f32.mrf.mxu3 }
 0x12d   :  { %v130_v47 = vadd.f32 %v117_v46, %v33_v29 }
 0x12f   :  { %v136_v48 = vadd.f32 %v232_v41, %v130_v47 }
 0x131   :  { %139 = vadd.xlane.f32.xlu0 %v136_v48  ;;  %v142_v49 = vmul.f32 %v136_v48, %v136_v48 }
 0x133   :  { %145 = vadd.xlane.f32.xlu1 %v142_v49 }
 0x198   :  { %v138_v50 = vpop.xlane.xlu0 %137 }
 0x199   :  { %v147_v51 = vmul.f32 0.03125, %v138_v50 }
 0x19a   :  { %v144_v52 = vpop.xlane.xlu1 %143 }
 0x19b   :  { %v151_v53 = vmul.f32 %v147_v51, %v147_v51  ;;  %v149_v54 = vmul.f32 0.03125, %v144_v52  ;;  %v155_v6 = vsub.f32 %v135_v44, %v147_v51 }
 0x19d   :  { %v153_v55 = vsub.f32 %v149_v54, %v151_v53 }
 0x19f   :  { %v157_v56 = vadd.f32 1e-05, %v153_v55 }
 0x1a1   :  { %235 = vrsqrt.f32 %v157_v56  ;;  %vm165_vm1 = vweird.f32 %v157_v56 }
 0x1a4   :  { %v140_v57 = vpop.xlane.xlu0 %139 }
 0x1a5   :  { %v148_v58 = vmul.f32 0.03125, %v140_v57 }
 0x1a6   :  { %v146_v59 = vpop.xlane.xlu1 %145 }
 0x1a7   :  { %v236_v60 = vpop.eup %235  ;;  %v152_v61 = vmul.f32 %v148_v58, %v148_v58  ;;  %v150_v62 = vmul.f32 0.03125, %v146_v59  ;;  %v156_v19 = vsub.f32 %v136_v48, %v148_v58 }
 0x1a8   :  { %v160_v63 = vmul.f32 %v236_v60, %v157_v56  ;;  %vm166_vm0 = vweird.f32 %v236_v60 }
 0x1a9   :  { %v154_v0 = vsub.f32 %v150_v62, %v152_v61  ;;  %vm167_vm2 = vmor %vm165_vm1, %vm166_vm0 }
 0x1aa   :  { %v161_v1 = vmul.f32 %v236_v60, %v160_v63 }
 0x1ab   :  { %v158_v2 = vadd.f32 1e-05, %v154_v0 }
 0x1ac   :  { %v162_v3 = vmul.f32 0.5, %v161_v1 }
 0x1ad   :  { %237 = vrsqrt.f32 %v158_v2  ;;  %vm175_vm4 = vweird.f32 %v158_v2 }
 0x1ae   :  { %v163_v4 = vsub.f32 1.5, %v162_v3 }
 0x1b0   :  { %v164_v5 = vmul.f32 %v236_v60, %v163_v4 }
 0x1b2   :  { %v168_v8 = vsel %vm167_vm2, %v236_v60, %v164_v5 }
 0x1b3   :  { %v238_v9 = vpop.eup %237  ;;  %v179_v11 = vmul.f32 %v168_v8, %v155_v6 }
 0x1b4   :  { %v170_v12 = vmul.f32 %v238_v9, %v158_v2  ;;  %vm176_vm3 = vweird.f32 %v238_v9 }
 0x1b5   :  { %v185_v13 = vmul.f32 %v233_v7, %v179_v11  ;;  %vm177_vm5 = vmor %vm175_vm4, %vm176_vm3 }
 0x1b6   :  { %v171_v14 = vmul.f32 %v238_v9, %v170_v12 }
 0x1b7   :  { %v191_v15 = vadd.f32 %v234_v10, %v185_v13 }
 0x1b8   :  { %v172_v16 = vmul.f32 0.5, %v171_v14 }
 0x1b9   :  { %193 = vst [vmem:[%s406_s7] sm:$0xff] %v191_v15 }
 0x1ba   :  { %v173_v17 = vsub.f32 1.5, %v172_v16 }
 0x1bc   :  { %v174_v18 = vmul.f32 %v238_v9, %v173_v17 }
 0x1be   :  { %v178_v20 = vsel %vm177_vm5, %v238_v9, %v174_v18 }
 0x1bf   :  { %v180_v21 = vmul.f32 %v178_v20, %v156_v19 }
 0x1c1   :  { %v186_v22 = vmul.f32 %v233_v7, %v180_v21 }
 0x1c3   :  { %v192_v23 = vadd.f32 %v234_v10, %v186_v22 }
 0x1c5   :  { %194 = vst [vmem:[%s406_s7 + $0x8] sm:$0xff] %v192_v23 }

</bundles_post_ra>
